<compile_context>
chip_gen: v6e
topology: v6e:2x2x1
jax: 0.10.0
libtpu: 0.0.40
codegen_flags: <defaults>
</compile_context>

<pallas_src>
import jax
import jax.numpy as jnp
from jax.experimental import pallas as pl
from jax.experimental.pallas import tpu as pltpu

LANE = 128


def _round_up(n, m):
    return ((n + m - 1) // m) * m


def policy_mlp_kernel(x_ref, w1_ref, b1_ref, w2_ref, b2_ref, w3_ref, b3_ref, o_ref):
    # linear1 + relu   (x and w1 share the compute dtype; accumulate in f32 on the MXU)
    h = jnp.dot(x_ref[...], w1_ref[...], preferred_element_type=jnp.float32)
    h = jnp.maximum(h + b1_ref[...], 0.0)
    # linear2 + relu   (cast back to the weight dtype for the MXU; no-op when f32)
    h = jnp.dot(h.astype(w2_ref.dtype), w2_ref[...], preferred_element_type=jnp.float32)
    h = jnp.maximum(h + b2_ref[...], 0.0)
    # linear3 + tanh
    h = jnp.dot(h.astype(w3_ref.dtype), w3_ref[...], preferred_element_type=jnp.float32)
    o_ref[...] = jnp.tanh(h + b3_ref[...]).astype(o_ref.dtype)


def init_policy_params(key, num_inputs, num_actions, hidden_size, init_w=0.003):
    """Mirror torch defaults: uniform +/- 1/sqrt(fan_in); last layer uniform +/- init_w."""
    k1, k2, k3, k4, k5, k6 = jax.random.split(key, 6)
    bound1 = 1.0 / jnp.sqrt(num_inputs)
    bound2 = 1.0 / jnp.sqrt(hidden_size)
    return {
        "w1": jax.random.uniform(k1, (hidden_size, num_inputs), jnp.float32, -bound1, bound1),
        "b1": jax.random.uniform(k2, (hidden_size,), jnp.float32, -bound1, bound1),
        "w2": jax.random.uniform(k3, (hidden_size, hidden_size), jnp.float32, -bound2, bound2),
        "b2": jax.random.uniform(k4, (hidden_size,), jnp.float32, -bound2, bound2),
        "w3": jax.random.uniform(k5, (num_actions, hidden_size), jnp.float32, -init_w, init_w),
        "b3": jax.random.uniform(k6, (num_actions,), jnp.float32, -init_w, init_w),
    }


def prepare_policy_params(params, *, param_dtype=jnp.float32):
    """One-time prep (no per-call XLA ops):
       * weights transposed to (in, out); output dims padded to 128 lanes with zeros
         (results stay exact); w1's *input* dim is kept at num_inputs so x needs no
         per-call feature padding.
       * weights cast to param_dtype (use jnp.bfloat16 for MXU-rate matmuls on scaled
         actors); biases stay f32 and are reshaped to (1, out) for broadcasting.
    """
    w1, b1 = params["w1"], params["b1"]   # (H, I), (H,)
    w2, b2 = params["w2"], params["b2"]   # (H, H), (H,)
    w3, b3 = params["w3"], params["b3"]   # (A, H), (A,)

    H, I = w1.shape
    A = w3.shape[0]
    Hp, Ap = _round_up(H, LANE), _round_up(A, LANE)

    def padt(w, rows, cols):
        wt = w.T  # (in, out)
        wt = jnp.pad(wt, ((0, rows - wt.shape[0]), (0, cols - wt.shape[1])))
        return wt.astype(param_dtype)

    def padb(b, cols):
        return jnp.pad(b[None, :], ((0, 0), (0, cols - b.shape[0])))  # keep f32

    return {
        "w1t": padt(w1, I, Hp),    # (I,  Hp)  -- input dim unpadded, matches raw x
        "b1r": padb(b1, Hp),       # (1,  Hp)  f32
        "w2t": padt(w2, Hp, Hp),   # (Hp, Hp)
        "b2r": padb(b2, Hp),       # (1,  Hp)  f32
        "w3t": padt(w3, Hp, Ap),   # (Hp, Ap)
        "b3r": padb(b3, Ap),       # (1,  Ap)  f32
        "dims": (I, H, A, Hp, Ap),
    }


def policy_network_forward(x, prepped, *, block_rows=256, out_dtype=jnp.float32,
                           slice_output=True):
    """x: (B, num_inputs). prepped: output of prepare_policy_params.
    Returns (B, num_actions) in out_dtype (or the 128-lane-padded slab if
    slice_output=False)."""
    I, H, A, Hp, Ap = prepped["dims"]
    B = x.shape[0]
    assert x.shape[1] == I, "x feature dim mismatch"
    param_dtype = prepped["w1t"].dtype

    # Adaptive batch tile: tiny batches -> one small (sublane-aligned) tile; big batches
    # -> 256-row tiles (fewer grid steps, better MXU fill). nb >= 2 is what lets the
    # "parallel" batch axis shard across both TensorCores on v7x.
    TM = min(block_rows, _round_up(max(B, 1), 8))
    Bp = _round_up(B, TM)
    nb = Bp // TM

    xk = x.astype(param_dtype)                       # no-op for f32 params
    if Bp != B:
        # Only for tiny / non-tile-multiple batches (8 rows for the demo). Zero rows are
        # computed then discarded; tile-aligned training batches skip this entirely.
        xk = jnp.pad(xk, ((0, Bp - B), (0, 0)))

    psize = jnp.dtype(param_dtype).itemsize
    osize = jnp.dtype(out_dtype).itemsize
    flops = 2 * Bp * (I * Hp + Hp * Hp + Hp * Ap)
    bytes_accessed = (
        Bp * I * psize                               # x read
        + (I * Hp + Hp * Hp + Hp * Ap) * psize       # weights (read once)
        + (2 * Hp + Ap) * 4                          # biases (f32)
        + Bp * Ap * osize                            # output writeback
    )

    def const_spec(a):
        # Weights / biases: constant index_map (fetched once, VMEM-resident) and
        # single-buffered -- no point double-buffering data that never changes.
        return pl.BlockSpec(a.shape, lambda i: (0, 0), pipeline_mode=pl.Buffered(1))

    out_padded = pl.pallas_call(
        policy_mlp_kernel,
        out_shape=jax.ShapeDtypeStruct((Bp, Ap), out_dtype),
        grid=(nb,),
        in_specs=[
            pl.BlockSpec((TM, I), lambda i: (i, 0)),   # x: tiled over batch rows
            const_spec(prepped["w1t"]),
            const_spec(prepped["b1r"]),
            const_spec(prepped["w2t"]),
            const_spec(prepped["b2r"]),
            const_spec(prepped["w3t"]),
            const_spec(prepped["b3r"]),
        ],
        out_specs=pl.BlockSpec((TM, Ap), lambda i: (i, 0)),   # lane-dense 128-padded stores
        compiler_params=pltpu.CompilerParams(
            dimension_semantics=("parallel",),
        ),
        cost_estimate=pl.CostEstimate(
            flops=flops,
            transcendentals=Bp * Ap,
            bytes_accessed=bytes_accessed,
        ),
    )(xk, prepped["w1t"], prepped["b1r"], prepped["w2t"], prepped["b2r"],
      prepped["w3t"], prepped["b3r"])

    if slice_output:
        return out_padded[:B, :A]
    return out_padded


if __name__ == "__main__":
    key = jax.random.PRNGKey(0)
    kx, kp = jax.random.split(key)

    batch = 2
    num_inputs = 16
    num_actions = 4
    hidden_size = 32

    x = jax.random.normal(kx, (batch, num_inputs), jnp.float32)
    params = init_policy_params(kp, num_inputs, num_actions, hidden_size)

    # Reference in plain JAX (same math as the PyTorch forward).
    h = jnp.maximum(x @ params["w1"].T + params["b1"], 0.0)
    h = jnp.maximum(h @ params["w2"].T + params["b2"], 0.0)
    ref = jnp.tanh(h @ params["w3"].T + params["b3"])

    # f32 path (exact vs reference).
    prepped_f32 = prepare_policy_params(params)
    out = jax.block_until_ready(policy_network_forward(x, prepped_f32))
    assert out.shape == (batch, num_actions)
    assert jnp.allclose(out, ref, atol=1e-5), "f32 mismatch vs reference"

    # bf16 weights/activations + bf16 output (MXU-rate path for scaled-up actors).
    prepped_bf16 = prepare_policy_params(params, param_dtype=jnp.bfloat16)
    out_bf16 = jax.block_until_ready(
        policy_network_forward(x, prepped_bf16, out_dtype=jnp.bfloat16))
    assert out_bf16.shape == (batch, num_actions)
    assert jnp.allclose(out_bf16.astype(jnp.float32), ref, atol=2e-2), \
        "bf16 mismatch vs reference"

    print("KERNEL_OK")
</pallas_src>

<mosaic_0001>
module attributes {stable_mosaic.version = 11 : i64} {
  func.func @policy_mlp_kernel(%arg0: i32, %arg1: memref<8x16xf32, #tpu.memory_space<vmem>>, %arg2: memref<16x128xf32, #tpu.memory_space<vmem>>, %arg3: memref<1x128xf32, #tpu.memory_space<vmem>>, %arg4: memref<128x128xf32, #tpu.memory_space<vmem>>, %arg5: memref<1x128xf32, #tpu.memory_space<vmem>>, %arg6: memref<128x128xf32, #tpu.memory_space<vmem>>, %arg7: memref<1x128xf32, #tpu.memory_space<vmem>>, %arg8: memref<8x128xf32, #tpu.memory_space<vmem>>) attributes {dimension_semantics = [#tpu.dimension_semantics<parallel>], iteration_bounds = array<i64: 1>, scalar_prefetch = 0 : i64, scratch_operands = 0 : i64, tpu.core_type = #tpu.core_type<tc>, window_params = [{transform_indices = @transform_0, window_bounds = array<i64: 8, 16>}, {pipeline_mode = #tpu.pipeline_mode<synchronous>, transform_indices = @transform_1, window_bounds = array<i64: 16, 128>}, {pipeline_mode = #tpu.pipeline_mode<synchronous>, transform_indices = @transform_2, window_bounds = array<i64: 1, 128>}, {pipeline_mode = #tpu.pipeline_mode<synchronous>, transform_indices = @transform_3, window_bounds = array<i64: 128, 128>}, {pipeline_mode = #tpu.pipeline_mode<synchronous>, transform_indices = @transform_4, window_bounds = array<i64: 1, 128>}, {pipeline_mode = #tpu.pipeline_mode<synchronous>, transform_indices = @transform_5, window_bounds = array<i64: 128, 128>}, {pipeline_mode = #tpu.pipeline_mode<synchronous>, transform_indices = @transform_6, window_bounds = array<i64: 1, 128>}, {transform_indices = @transform_7, window_bounds = array<i64: 8, 128>}]} {
    %c0 = arith.constant 0 : index
    %c0_0 = arith.constant 0 : index
    %0 = vector.load %arg1[%c0, %c0_0] : memref<8x16xf32, #tpu.memory_space<vmem>>, vector<8x16xf32>
    %c0_1 = arith.constant 0 : index
    %c0_2 = arith.constant 0 : index
    %1 = vector.load %arg2[%c0_1, %c0_2] : memref<16x128xf32, #tpu.memory_space<vmem>>, vector<16x128xf32>
    %cst = arith.constant dense<0.000000e+00> : vector<8x128xf32>
    %2 = tpu.matmul %0, %1, %cst {dimension_numbers = #tpu.dot_dimension_numbers<[1], [0], [0], [1], [0, 0, 1, 1], [], []>} : vector<8x16xf32>, vector<16x128xf32>, vector<8x128xf32> -> vector<8x128xf32>
    %c0_3 = arith.constant 0 : index
    %c0_4 = arith.constant 0 : index
    %3 = vector.load %arg3[%c0_3, %c0_4] : memref<1x128xf32, #tpu.memory_space<vmem>>, vector<1x128xf32>
    %4 = vector.broadcast %3 : vector<1x128xf32> to vector<8x128xf32>
    %5 = arith.addf %2, %4 : vector<8x128xf32>
    %cst_5 = arith.constant 0.000000e+00 : f32
    %6 = vector.broadcast %cst_5 : f32 to vector<8x128xf32>
    %7 = arith.maximumf %5, %6 : vector<8x128xf32>
    %c0_6 = arith.constant 0 : index
    %c0_7 = arith.constant 0 : index
    %8 = vector.load %arg4[%c0_6, %c0_7] : memref<128x128xf32, #tpu.memory_space<vmem>>, vector<128x128xf32>
    %cst_8 = arith.constant dense<0.000000e+00> : vector<8x128xf32>
    %9 = tpu.matmul %7, %8, %cst_8 {dimension_numbers = #tpu.dot_dimension_numbers<[1], [0], [0], [1], [0, 0, 1, 1], [], []>} : vector<8x128xf32>, vector<128x128xf32>, vector<8x128xf32> -> vector<8x128xf32>
    %c0_9 = arith.constant 0 : index
    %c0_10 = arith.constant 0 : index
    %10 = vector.load %arg5[%c0_9, %c0_10] : memref<1x128xf32, #tpu.memory_space<vmem>>, vector<1x128xf32>
    %11 = vector.broadcast %10 : vector<1x128xf32> to vector<8x128xf32>
    %12 = arith.addf %9, %11 : vector<8x128xf32>
    %cst_11 = arith.constant 0.000000e+00 : f32
    %13 = vector.broadcast %cst_11 : f32 to vector<8x128xf32>
    %14 = arith.maximumf %12, %13 : vector<8x128xf32>
    %c0_12 = arith.constant 0 : index
    %c0_13 = arith.constant 0 : index
    %15 = vector.load %arg6[%c0_12, %c0_13] : memref<128x128xf32, #tpu.memory_space<vmem>>, vector<128x128xf32>
    %cst_14 = arith.constant dense<0.000000e+00> : vector<8x128xf32>
    %16 = tpu.matmul %14, %15, %cst_14 {dimension_numbers = #tpu.dot_dimension_numbers<[1], [0], [0], [1], [0, 0, 1, 1], [], []>} : vector<8x128xf32>, vector<128x128xf32>, vector<8x128xf32> -> vector<8x128xf32>
    %c0_15 = arith.constant 0 : index
    %c0_16 = arith.constant 0 : index
    %17 = vector.load %arg7[%c0_15, %c0_16] : memref<1x128xf32, #tpu.memory_space<vmem>>, vector<1x128xf32>
    %18 = vector.broadcast %17 : vector<1x128xf32> to vector<8x128xf32>
    %19 = arith.addf %16, %18 : vector<8x128xf32>
    %20 = math.tanh %19 : vector<8x128xf32>
    %c0_17 = arith.constant 0 : index
    %c0_18 = arith.constant 0 : index
    %21 = vector.load %arg8[%c0_17, %c0_18] : memref<8x128xf32, #tpu.memory_space<vmem>>, vector<8x128xf32>
    tpu.vector_store %arg8[%c0_17, %c0_18], %20 {strides = array<i32>} : memref<8x128xf32, #tpu.memory_space<vmem>>, vector<8x128xf32>,
    return
  }
  func.func @transform_0(%arg0: i32) -> (i32, i32) {
    %c0_i32 = arith.constant 0 : i32
    %c0_i32_0 = arith.constant 0 : i32
    return %arg0, %c0_i32 : i32, i32
  }
  func.func @transform_1(%arg0: i32) -> (i32, i32) {
    %c0_i32 = arith.constant 0 : i32
    %c0_i32_0 = arith.constant 0 : i32
    %c0_i32_1 = arith.constant 0 : i32
    return %c0_i32, %c0_i32_0 : i32, i32
  }
  func.func @transform_2(%arg0: i32) -> (i32, i32) {
    %c0_i32 = arith.constant 0 : i32
    %c0_i32_0 = arith.constant 0 : i32
    %c0_i32_1 = arith.constant 0 : i32
    return %c0_i32, %c0_i32_0 : i32, i32
  }
  func.func @transform_3(%arg0: i32) -> (i32, i32) {
    %c0_i32 = arith.constant 0 : i32
    %c0_i32_0 = arith.constant 0 : i32
    %c0_i32_1 = arith.constant 0 : i32
    return %c0_i32, %c0_i32_0 : i32, i32
  }
  func.func @transform_4(%arg0: i32) -> (i32, i32) {
    %c0_i32 = arith.constant 0 : i32
    %c0_i32_0 = arith.constant 0 : i32
    %c0_i32_1 = arith.constant 0 : i32
    return %c0_i32, %c0_i32_0 : i32, i32
  }
  func.func @transform_5(%arg0: i32) -> (i32, i32) {
    %c0_i32 = arith.constant 0 : i32
    %c0_i32_0 = arith.constant 0 : i32
    %c0_i32_1 = arith.constant 0 : i32
    return %c0_i32, %c0_i32_0 : i32, i32
  }
  func.func @transform_6(%arg0: i32) -> (i32, i32) {
    %c0_i32 = arith.constant 0 : i32
    %c0_i32_0 = arith.constant 0 : i32
    %c0_i32_1 = arith.constant 0 : i32
    return %c0_i32, %c0_i32_0 : i32, i32
  }
  func.func @transform_7(%arg0: i32) -> (i32, i32) {
    %c0_i32 = arith.constant 0 : i32
    %c0_i32_0 = arith.constant 0 : i32
    return %arg0, %c0_i32 : i32, i32
  }
}

</mosaic_0001>

<bundles_post_ra>
// kernel: tpu_custom_call.1
= control target key start
LH: loop header
LB: loop body
LE: loop exit
PB: predicated region body
PF: predicated region fallthrough
CT: control target
= control target key end

     0   :  { %12 = vsyncpa [#allocation3], 0  ;;  %s730_s0 = inlined_call_operand.hbm [shape: f32[8,16], index: 0, kind: input, shape index: {}]   ;;  %s731_s1 = inlined_call_operand.hbm [shape: f32[16,128], index: 1, kind: input, shape index: {}]   ;;  %s732_s2 = inlined_call_operand.vmem [shape: f32[1,128], index: 2, kind: input, shape index: {}]   ;;  %s733_s3 = inlined_call_operand.hbm [shape: f32[128,128], index: 3, kind: input, shape index: {}]   ;;  %s734_s4 = inlined_call_operand.vmem [shape: f32[1,128], index: 4, kind: input, shape index: {}]   ;;  %s735_s5 = inlined_call_operand.hbm [shape: f32[128,128], index: 5, kind: input, shape index: {}]   ;;  %s736_s6 = inlined_call_operand.vmem [shape: f32[1,128], index: 6, kind: input, shape index: {}]   ;;  %s737_s7 = inlined_call_operand.hbm [shape: f32[8,128], index: 7, kind: output, shape index: {}]  }
   0x1   :  { %13 = vsyncpa [#allocation6], 0 }
   0x2   :  { %14 = vsyncpa [#allocation9], 0 }
   0x3   :  { %15 = vsyncpa [#allocation4], 0  ;;  %s608_s24 = smov [#allocation5]  }
   0x4   :  { %s31_s25 = sshll.u32 %s608_s24, 4  ;;  %s32_s25 = int_to_ptr.vmem [resolvable:$true] %s31_s25 }
   0x5   :  { %s508_s26 = scalar_lea.vmem %s32_s25, 256  ;;  %p513_p1 = scmp.lt.s32.totalorder %s32_s25, %s32_s25 }
   0x6   :  { %p509_p0 = scmp.ne.s32.totalorder %s32_s25, %s508_s26  ;;  %p514_p2 = scmp.lt.s32.totalorder %s508_s26, %s508_s26 }
   0x8   :  { %p515_p3 = por %p514_p2, %p513_p1 }
   0xa   :  { %p516_p4 = pnand %p515_p3, %p509_p0 }
   0xc   :  { %519 = shalt.err (!%p516_p4)
}
   0xd   :  { %s609_s27 = smov 128   ;;  %s610_s28 = smov 8  }
   0xe   :  { %37 = dma.hbm_to_vmem [thread:$0]  %s731_s1, 256, %s32_s25, [#allocation6], %s609_s27, %s609_s27, %s610_s28  }
   0xf   :  { %s611_s8 = smov [#allocation2]   ;;  %s612_s10 = smov [#allocation7]  }
  0x10   :  { %s22_s9 = sshll.u32 %s611_s8, 4  ;;  %s45_s11 = sshll.u32 %s612_s10, 4  ;;  %s23_s9 = int_to_ptr.vmem [resolvable:$true] %s22_s9  ;;  %s46_s11 = int_to_ptr.vmem [resolvable:$true] %s45_s11 }
  0x11   :  { %s528_s12 = scalar_lea.vmem %s23_s9, 128  ;;  %p533_p6 = scmp.lt.s32.totalorder %s23_s9, %s23_s9 }
  0x12   :  { %p529_p5 = scmp.ne.s32.totalorder %s23_s9, %s528_s12  ;;  %p534_p7 = scmp.lt.s32.totalorder %s528_s12, %s528_s12 }
  0x14   :  { %p535_p8 = por %p534_p7, %p533_p6 }
  0x16   :  { %p536_p9 = pnand %p535_p8, %p529_p5 }
  0x18   :  { %539 = shalt.err (!%p536_p9)
}
  0x19   :  { %25 = dma.hbm_to_vmem [thread:$0]  %s730_s0, 128, %s23_s9, [#allocation3]  }
  0x1a   :  { %s548_s15 = scalar_lea.vmem %s46_s11, 2048  ;;  %p553_p11 = scmp.lt.s32.totalorder %s46_s11, %s46_s11 }
  0x1b   :  { %p549_p10 = scmp.ne.s32.totalorder %s46_s11, %s548_s15  ;;  %p554_p12 = scmp.lt.s32.totalorder %s548_s15, %s548_s15 }
  0x1d   :  { %p555_p13 = por %p554_p12, %p553_p11 }
  0x1f   :  { %p556_p0 = pnand %p555_p13, %p549_p10 }
  0x21   :  { %559 = shalt.err (!%p556_p0)
}
  0x22   :  { %51 = dma.hbm_to_vmem [thread:$0]  %s733_s3, 2048, %s46_s11, [#allocation6], %s609_s27, %s609_s27, %s610_s28  }
  0x23   :  { %s613_s17 = smov [#allocation8]  }
  0x24   :  { %s59_s18 = sshll.u32 %s613_s17, 4  ;;  %s60_s18 = int_to_ptr.vmem [resolvable:$true] %s59_s18 }
  0x25   :  { %s568_s19 = scalar_lea.vmem %s60_s18, 2048  ;;  %p573_p2 = scmp.lt.s32.totalorder %s60_s18, %s60_s18 }
  0x26   :  { %p569_p1 = scmp.ne.s32.totalorder %s60_s18, %s568_s19  ;;  %p574_p3 = scmp.lt.s32.totalorder %s568_s19, %s568_s19 }
  0x28   :  { %p575_p4 = por %p574_p3, %p573_p2 }
  0x2a   :  { %p576_p5 = pnand %p575_p4, %p569_p1 }
  0x2c   :  { %579 = shalt.err (!%p576_p5)
}
  0x2d   :  { %65 = dma.hbm_to_vmem [thread:$0]  %s735_s5, 2048, %s60_s18, [#allocation9], %s609_s27, %s609_s27, %s610_s28  }
  0x2e   :  { %600 = dma.done.wait [#allocation3], 128  }
  0x2f   :  { %601 = vsyncadd [#allocation3], 4294967168 }
  0x30   :  { %602 = dma.done.wait [#allocation6], 2304  }
  0x31   :  { %603 = vsyncadd [#allocation6], 4294964992 }
  0x32   :  { %604 = dma.done.wait [#allocation9], 2048  }
  0x33   :  { %605 = vsyncadd [#allocation9], 4294965248  ;;  %v614_v0 = vmov 0.0   ;;  %vm615_vm0 = vmmov 0   ;;  %v82_v1 = vld [vmem:[#allocation5 + $0x8] sm:$0xff]  ;;  %v81_v2 = vld [vmem:[#allocation5] sm:$0xff] }
  0x34   :  { %412 = vmatprep.subr.mxu0 %v614_v0  ;;  %416 = vmatprep.mubr.msk.f32.mxu0 %vm615_vm0, %v614_v0  ;;  %v80_v3 = vld [vmem:[#allocation2] sm:$0xff]  ;;  %vm90_vm1 = vcmask 130048   ;;  %v180_v4 = vld [vmem:[#allocation7 + $0x78] sm:$0xff]  ;;  %v179_v5 = vld [vmem:[#allocation7 + $0x70] sm:$0xff]  ;;  %s616_s24 = smov [#allocation10]  }
  0x35   :  { %419 = vmatprep.subr.mxu1 %v614_v0  ;;  %451 = vmatprep.mubr.msk.f32.mxu1 %vm615_vm0, %v614_v0  ;;  %v178_v6 = vld [vmem:[#allocation7 + $0x68] sm:$0xff]  ;;  %v177_v7 = vld [vmem:[#allocation7 + $0x60] sm:$0xff]  ;;  %v176_v8 = vld [vmem:[#allocation7 + $0x58] sm:$0xff]  ;;  %s360_s25 = sshll.u32 %s616_s24, 4  ;;  %s361_s25 = int_to_ptr.vmem [resolvable:$true] %s360_s25 }
  0x36   :  { %413 = vmatpush3.msra.mxu0 %v82_v1  ;;  %420 = vmatpush3.msra.mxu1 %v180_v4  ;;  %v175_v9 = vld [vmem:[#allocation7 + $0x50] sm:$0xff]  ;;  %v174_v10 = vld [vmem:[#allocation7 + $0x48] sm:$0xff]  ;;  %v173_v11 = vld [vmem:[#allocation7 + $0x40] sm:$0xff]  ;;  %s580_s26 = scalar_lea.vmem %s361_s25, 128  ;;  %p585_p7 = scmp.lt.s32.totalorder %s361_s25, %s361_s25 }
  0x37   :  { %414 = vmatprep.subr.mxu0 %v614_v0  ;;  %421 = vmatprep.subr.mxu1 %v614_v0  ;;  %v172_v12 = vld [vmem:[#allocation7 + $0x38] sm:$0xff]  ;;  %v171_v13 = vld [vmem:[#allocation7 + $0x30] sm:$0xff]  ;;  %v170_v14 = vld [vmem:[#allocation7 + $0x28] sm:$0xff]  ;;  %p581_p6 = scmp.ne.s32.totalorder %s361_s25, %s580_s26  ;;  %p586_p8 = scmp.lt.s32.totalorder %s580_s26, %s580_s26 }
  0x38   :  { %415 = vmatpush3.msra.mxu0 %v81_v2  ;;  %422 = vmatpush3.msra.mxu1 %v179_v5  ;;  %v169_v15 = vld [vmem:[#allocation7 + $0x20] sm:$0xff]  ;;  %v168_v16 = vld [vmem:[#allocation7 + $0x18] sm:$0xff]  ;;  %v167_v17 = vld [vmem:[#allocation7 + $0x10] sm:$0xff] }
  0x39   :  { %417 = vmatmul.mubr.msk.f32.vlgmr.msra.gmra.mxu0 %vm90_vm1, %v80_v3  ;;  %423 = vmatprep.subr.mxu1 %v614_v0  ;;  %v166_v18 = vld [vmem:[#allocation7 + $0x8] sm:$0xff]  ;;  %v165_v19 = vld [vmem:[#allocation7] sm:$0xff]  ;;  %v274_v20 = vld [vmem:[#allocation8 + $0x78] sm:$0xff]  ;;  %p587_p9 = por %p586_p8, %p585_p7 }
  0x3a   :  { %454 = vmatprep.subr.mxu0 %v614_v0  ;;  %424 = vmatpush3.msra.mxu1 %v178_v6  ;;  %v273_v21 = vld [vmem:[#allocation8 + $0x70] sm:$0xff]  ;;  %v272_v22 = vld [vmem:[#allocation8 + $0x68] sm:$0xff]  ;;  %v271_v23 = vld [vmem:[#allocation8 + $0x60] sm:$0xff] }
  0x3b   :  { %486 = vmatprep.mubr.msk.f32.mxu0 %vm615_vm0, %v614_v0  ;;  %425 = vmatprep.subr.mxu1 %v614_v0  ;;  %v270_v24 = vld [vmem:[#allocation8 + $0x58] sm:$0xff]  ;;  %v269_v25 = vld [vmem:[#allocation8 + $0x50] sm:$0xff]  ;;  %v268_v26 = vld [vmem:[#allocation8 + $0x48] sm:$0xff]  ;;  %p588_p10 = pnand %p587_p9, %p581_p6 }
  0x3c   :  { %426 = vmatpush3.msra.mxu1 %v177_v7  ;;  %455 = vmatpush3.msra.mxu0 %v274_v20  ;;  %v267_v27 = vld [vmem:[#allocation8 + $0x40] sm:$0xff]  ;;  %v266_v28 = vld [vmem:[#allocation8 + $0x38] sm:$0xff]  ;;  %v265_v29 = vld [vmem:[#allocation8 + $0x30] sm:$0xff] }
  0x3d   :  { %427 = vmatprep.subr.mxu1 %v614_v0  ;;  %456 = vmatprep.subr.mxu0 %v614_v0  ;;  %v264_v30 = vld [vmem:[#allocation8 + $0x28] sm:$0xff]  ;;  %v263_v31 = vld [vmem:[#allocation8 + $0x20] sm:$0xff]  ;;  %v262_v32 = vld [vmem:[#allocation8 + $0x18] sm:$0xff] }
  0x3e   :  { %428 = vmatpush3.msra.mxu1 %v176_v8  ;;  %457 = vmatpush3.msra.mxu0 %v273_v21  ;;  %v371_v33 = vld [vmem:[%s732_s2] ss:$0 sm:$0xff]  ;;  %v261_v38 = vld [vmem:[#allocation8 + $0x10] sm:$0xff]  ;;  %v259_v40 = vld [vmem:[#allocation8] sm:$0xff] }
  0x3f   :  { %429 = vmatprep.subr.mxu1 %v614_v0  ;;  %458 = vmatprep.subr.mxu0 %v614_v0  ;;  %v260_v39 = vld [vmem:[#allocation8 + $0x8] sm:$0xff] }
  0x40   :  { %430 = vmatpush3.msra.mxu1 %v175_v9  ;;  %459 = vmatpush3.msra.mxu0 %v272_v22  ;;  %v373_v41 = vld [vmem:[%s734_s4] ss:$0 sm:$0xff] }
  0x41   :  { %431 = vmatprep.subr.mxu1 %v614_v0  ;;  %460 = vmatprep.subr.mxu0 %v614_v0  ;;  %v374_v46 = vld [vmem:[%s736_s6] ss:$0 sm:$0xff] }
  0x42   :  { %432 = vmatpush3.msra.mxu1 %v174_v10  ;;  %461 = vmatpush3.msra.mxu0 %v271_v23 }
  0x43   :  { %433 = vmatprep.subr.mxu1 %v614_v0  ;;  %462 = vmatprep.subr.mxu0 %v614_v0 }
  0x44   :  { %434 = vmatpush3.msra.mxu1 %v173_v11  ;;  %463 = vmatpush3.msra.mxu0 %v270_v24 }
  0x45   :  { %435 = vmatprep.subr.mxu1 %v614_v0  ;;  %464 = vmatprep.subr.mxu0 %v614_v0 }
  0x46   :  { %436 = vmatpush3.msra.mxu1 %v172_v12  ;;  %465 = vmatpush3.msra.mxu0 %v269_v25 }
  0x47   :  { %437 = vmatprep.subr.mxu1 %v614_v0  ;;  %466 = vmatprep.subr.mxu0 %v614_v0 }
  0x48   :  { %438 = vmatpush3.msra.mxu1 %v171_v13  ;;  %467 = vmatpush3.msra.mxu0 %v268_v26 }
  0x49   :  { %439 = vmatprep.subr.mxu1 %v614_v0  ;;  %468 = vmatprep.subr.mxu0 %v614_v0 }
  0x4a   :  { %440 = vmatpush3.msra.mxu1 %v170_v14  ;;  %469 = vmatpush3.msra.mxu0 %v267_v27 }
  0x4b   :  { %441 = vmatprep.subr.mxu1 %v614_v0  ;;  %470 = vmatprep.subr.mxu0 %v614_v0 }
  0x4c   :  { %442 = vmatpush3.msra.mxu1 %v169_v15  ;;  %471 = vmatpush3.msra.mxu0 %v266_v28 }
  0x4d   :  { %443 = vmatprep.subr.mxu1 %v614_v0  ;;  %472 = vmatprep.subr.mxu0 %v614_v0 }
  0x4e   :  { %444 = vmatpush3.msra.mxu1 %v168_v16  ;;  %473 = vmatpush3.msra.mxu0 %v265_v29 }
  0x4f   :  { %445 = vmatprep.subr.mxu1 %v614_v0  ;;  %474 = vmatprep.subr.mxu0 %v614_v0 }
  0x50   :  { %446 = vmatpush3.msra.mxu1 %v167_v17  ;;  %475 = vmatpush3.msra.mxu0 %v264_v30 }
  0x51   :  { %447 = vmatprep.subr.mxu1 %v614_v0  ;;  %476 = vmatprep.subr.mxu0 %v614_v0 }
  0x52   :  { %448 = vmatpush3.msra.mxu1 %v166_v18  ;;  %477 = vmatpush3.msra.mxu0 %v263_v31 }
  0x53   :  { %449 = vmatprep.subr.mxu1 %v614_v0  ;;  %478 = vmatprep.subr.mxu0 %v614_v0 }
  0x54   :  { %450 = vmatpush3.msra.mxu1 %v165_v19  ;;  %479 = vmatpush3.msra.mxu0 %v262_v32 }
  0x55   :  { %480 = vmatprep.subr.mxu0 %v614_v0 }
  0x56   :  { %481 = vmatpush3.msra.mxu0 %v261_v38 }
  0x57   :  { %482 = vmatprep.subr.mxu0 %v614_v0 }
  0x58   :  { %483 = vmatpush3.msra.mxu0 %v260_v39 }
  0x59   :  { %484 = vmatprep.subr.mxu0 %v614_v0 }
  0x5a   :  { %485 = vmatpush3.msra.mxu0 %v259_v40 }
  0xf9   :  { %v160_v34 = vpop.f32.mrf.mxu0 }
  0xfa   :  { %v161_v35 = vadd.f32 %v371_v33, %v160_v34 }
  0xfb   :  { %v418_v36 = vpop.f32.mrf.mxu0 }
  0xfc   :  { %v164_v37 = vmax.f32 %v161_v35, 0.0 }
  0xfe   :  { %452 = vmatmul.mubr.f32.vlgmr.msra.gmra.mxu1 %v164_v37 }
 0x1be   :  { %v254_v42 = vpop.f32.mrf.mxu1 }
 0x1bf   :  { %v255_v43 = vadd.f32 %v373_v41, %v254_v42 }
 0x1c0   :  { %v453_v44 = vpop.f32.mrf.mxu1 }
 0x1c1   :  { %v258_v45 = vmax.f32 %v255_v43, 0.0 }
 0x1c3   :  { %487 = vmatmul.mubr.f32.vlgmr.msra.gmra.mxu0 %v258_v45 }
 0x283   :  { %v348_v47 = vpop.f32.mrf.mxu0 }
 0x284   :  { %v349_v48 = vadd.f32 %v374_v46, %v348_v47 }
 0x285   :  { %v488_v49 = vpop.f32.mrf.mxu0 }
 0x286   :  { %498 = vtanh.f32 %v349_v48 }
 0x293   :  { %v499_v50 = vpop.eup %498 }
 0x294   :  { %353 = vst [vmem:[#allocation10] sm:$0xff] %v499_v50 }
 0x295   :  { %591 = shalt.err (!%p588_p10)
}
 0x296   :  { %363 = dma.vmem_to_hbm [thread:$0]  %s361_s25, 128, %s737_s7, [#allocation4]  }
 0x297   :  { %606 = dma.done.wait [#allocation4], 128  }
 0x298   :  { %607 = vsyncadd [#allocation4], 4294967168 }
 0x299   :  { %367 = vsyncpa [#allocation3], 1 }
 0x29a   :  { %368 = vsyncpa [#allocation6], 1 }
 0x29b   :  { %369 = vsyncpa [#allocation9], 1 }
 0x29c   :  { %370 = vsyncpa [#allocation4], 1 }

</bundles_post_ra>
